<compile_context>
chip_gen: v6e
topology: v6e:2x2x1
jax: 0.10.0
libtpu: 0.0.40
codegen_flags: <defaults>
</compile_context>

<pallas_src>
import functools

import jax
import jax.numpy as jnp
from jax.experimental import pallas as pl
from jax.experimental.pallas import tpu as pltpu


def _round_up(x, m):
    return (x + m - 1) // m * m


def _ronn_fused_kernel(x_ref, w_ref, b_ref, o_ref, *, n_layers, kernel_size,
                       dilations, residual):
    """One (batch, time-tile) grid step; all ConvolutionalBlocks fused.

    x_ref: (C_pad, T_in)                 f32 input window (output tile + halo)
    w_ref: (n_layers, C_pad, K*C_pad)    bf16 shared weights, k-major flattened
    b_ref: (n_layers, C_pad, 1)          f32 bias
    o_ref: (C_pad, T_out)                f32 output tile (T_out % 128 == 0)
    """
    K = kernel_size
    T = x_ref.shape[-1]
    z = x_ref[...]                                    # (C_pad, T) f32

    for n in range(n_layers):                         # static unroll
        d = dilations[n]
        # Constant-shape dilated time shifts via XLU lane rotation:
        # rolls[k][c, t] == z[c, t + k*d]  for every position that matters.
        rolls = []
        for k in range(K):
            s = (k * d) % T
            rolls.append(z if s == 0 else pltpu.roll(z, T - s, 1))
        slab = jnp.concatenate(rolls, axis=0).astype(w_ref.dtype)  # (K*C_pad, T)

        # Single MXU matmul per layer: shared weights, time (lane-dense) as N.
        y = jnp.dot(w_ref[n], slab, preferred_element_type=jnp.float32)
        y = y + b_ref[n]                              # (C_pad, 1) broadcast
        y = jnp.maximum(y, 0.0)                       # ReLU

        if residual:
            crop = (d * (K - 1)) // 2                 # center_crop start offset
            if crop % d == 0 and crop // d < K:
                res = rolls[crop // d]                # reuse existing roll (f32)
            else:
                s2 = crop % T
                res = z if s2 == 0 else pltpu.roll(z, T - s2, 1)
            y = y + res
        z = y

    # Only the first T_out positions of this tile are valid; halo / padding
    # tail is garbage and is dropped here (lane-aligned static slice).
    o_ref[...] = z[:, :o_ref.shape[-1]].astype(o_ref.dtype)


def _prep_shared_params(params, c_pad, kernel_size, mxu_dtype):
    """Pad channels to c_pad and flatten weights k-major: col = k*c_pad + c."""
    w_list, b_list = [], []
    for w, b in params:
        cout, cin, k = w.shape
        assert k == kernel_size
        w_pad = jnp.zeros((c_pad, c_pad, kernel_size), jnp.float32)
        w_pad = w_pad.at[:cout, :cin, :].set(w.astype(jnp.float32))
        # [o, k*c_pad + c] = W[o, c, k]  — must match the slab row order.
        w_flat = jnp.transpose(w_pad, (0, 2, 1)).reshape(c_pad,
                                                         kernel_size * c_pad)
        w_list.append(w_flat)
        b_pad = jnp.zeros((c_pad, 1), jnp.float32)
        b_pad = b_pad.at[:cout, :].set(
            jnp.reshape(b, (cout, 1)).astype(jnp.float32))
        b_list.append(b_pad)
    return jnp.stack(w_list).astype(mxu_dtype), jnp.stack(b_list)


def ronn_forward(params, x, *, dilations, stride=1, residual=False,
                 activation='ReLU', time_block=512, mxu_dtype=jnp.bfloat16):
    """ronnModel.forward with y=None, as one time-tiled fused Pallas call."""
    if activation != 'ReLU':
        # TODO(synk): other get_activation() choices not implemented.
        raise NotImplementedError(f"activation {activation!r} not implemented")
    if stride != 1:
        # TODO(synk): stride > 1 needs a strided / decimating layout.
        raise NotImplementedError("stride != 1 not implemented")

    B, cin0, L = x.shape
    n_layers = len(params)
    assert len(dilations) == n_layers
    K = params[0][0].shape[-1]
    couts = [w.shape[0] for w, _ in params]
    cins = [w.shape[1] for w, _ in params]
    if cins[0] != cin0:
        raise ValueError("first layer in_channels mismatch with input")
    if residual and any(ci != co for ci, co in zip(cins, couts)):
        raise ValueError(
            "residual=True requires in_channels == out_channels in every block")

    c_pad = _round_up(max([cin0] + cins + couts), 8)
    n_out = couts[-1]

    # Receptive field / valid output length (stride == 1, no padding).
    R = sum(d * (K - 1) for d in dilations)
    l_final = L - R
    if l_final <= 0:
        raise ValueError("receptive field exceeds input length")

    # Time tiling: lane-dense output tile, input tile carries an R-sample halo.
    t_out = min(_round_up(max(time_block, 128), 128), _round_up(l_final, 128))
    n_tiles = (l_final + t_out - 1) // t_out
    t_in = _round_up(t_out + R, 128)

    w_all, b_all = _prep_shared_params(params, c_pad, K, mxu_dtype)

    # Zero-pad channels/time and materialize the overlapping (halo) windows
    # once in HBM; duplication overhead ~ (t_in - t_out)/t_out.
    # TODO(synk): a zero-copy overlapping window (pl.Element halo index_map)
    #             would avoid this staging pass entirely.
    l_total = (n_tiles - 1) * t_out + t_in
    x_pad = jnp.zeros((B, c_pad, l_total), jnp.float32)
    x_pad = x_pad.at[:, :cin0, :L].set(x.astype(jnp.float32))
    x_tiles = jnp.stack(
        [jax.lax.slice_in_dim(x_pad, i * t_out, i * t_out + t_in, axis=2)
         for i in range(n_tiles)], axis=1)          # (B, n_tiles, c_pad, t_in)

    kernel = functools.partial(
        _ronn_fused_kernel, n_layers=n_layers, kernel_size=K,
        dilations=tuple(dilations), residual=residual)

    flops = int(n_layers * B * n_tiles
                * (2 * c_pad * (K * c_pad) * t_in + 4 * c_pad * t_in))
    bytes_accessed = int(4 * (x_tiles.size + b_all.size
                              + B * n_tiles * c_pad * t_out)
                         + 2 * w_all.size)

    out = pl.pallas_call(
        kernel,
        out_shape=jax.ShapeDtypeStruct((B, n_tiles, c_pad, t_out), jnp.float32),
        grid=(B, n_tiles),
        in_specs=[
            pl.BlockSpec((None, None, c_pad, t_in),
                         lambda b, i: (b, i, 0, 0)),
            pl.BlockSpec((n_layers, c_pad, K * c_pad),
                         lambda b, i: (0, 0, 0)),        # resident weights
            pl.BlockSpec((n_layers, c_pad, 1),
                         lambda b, i: (0, 0, 0)),        # resident bias
        ],
        out_specs=pl.BlockSpec((None, None, c_pad, t_out),
                               lambda b, i: (b, i, 0, 0)),
        compiler_params=pltpu.CompilerParams(
            dimension_semantics=("parallel", "parallel"),
            vmem_limit_bytes=32 * 1024 * 1024),
        cost_estimate=pl.CostEstimate(
            flops=flops, transcendentals=0, bytes_accessed=bytes_accessed),
    )(x_tiles, w_all, b_all)

    out = jnp.transpose(out, (0, 2, 1, 3)).reshape(B, c_pad, n_tiles * t_out)
    return out[:, :n_out, :l_final].astype(x.dtype)


def init_ronn_params(key, *, n_inputs, n_outputs, n_layers, n_channels,
                     kernel_size):
    """Deterministic parameter init mirroring ronnModel.__init__ shapes.

    Conv weights ~ N(0, 1) (matching torch.nn.init.normal_ on 'weight' params),
    biases ~ small uniform.
    """
    params = []
    for n in range(n_layers):
        cin = n_channels if n != 0 else n_inputs
        cout = n_channels if n != n_layers - 1 else n_outputs
        key, wk, bk = jax.random.split(key, 3)
        w = jax.random.normal(wk, (cout, cin, kernel_size), jnp.float32)
        bound = 1.0 / (cin * kernel_size) ** 0.5
        b = jax.random.uniform(bk, (cout, 1), jnp.float32, -bound, bound)
        params.append((w, b))
    return params


def _reference_forward(params, x, *, dilations, stride, residual):
    """Pure-JAX reference (lax conv) reproducing the PyTorch semantics."""
    for (w, b), dilation in zip(params, dilations):
        x_in = x
        y = jax.lax.conv_general_dilated(
            x, w, window_strides=(stride,), padding='VALID',
            rhs_dilation=(dilation,),
            dimension_numbers=('NCH', 'OIH', 'NCH'))
        y = y + b[None, :, :]              # (1, Cout, 1) broadcast
        y = jnp.maximum(y, 0.0)            # ReLU
        if residual:
            lout = y.shape[-1]
            start = (x_in.shape[-1] - lout) // 2
            y = y + x_in[..., start:start + lout]   # center_crop residual
        x = y
    return x


if __name__ == "__main__":
    # Model config (all channel counts equal so the residual add is valid).
    n_inputs = n_outputs = n_channels = 8
    n_layers = 3
    kernel_size = 3
    stride = 1
    dilations = [1, 2, 4]
    residual = True
    activation = 'ReLU'

    B, L = 2, 64

    key = jax.random.PRNGKey(0)
    key, xk = jax.random.split(key)
    x = jax.random.normal(xk, (B, n_inputs, L), jnp.float32)

    params = init_ronn_params(
        key, n_inputs=n_inputs, n_outputs=n_outputs, n_layers=n_layers,
        n_channels=n_channels, kernel_size=kernel_size)

    out = ronn_forward(params, x, dilations=dilations, stride=stride,
                       residual=residual, activation=activation)
    out = jax.block_until_ready(out)

    ref = _reference_forward(params, x, dilations=dilations, stride=stride,
                             residual=residual)
    assert out.shape == ref.shape, (out.shape, ref.shape)

    # bf16 MXU operands with f32 accumulation: compare with a relative
    # tolerance (expected rel. error << 1%; 5% threshold for safety).
    err = float(jnp.max(jnp.abs(out - ref)))
    scale = float(jnp.max(jnp.abs(ref)))
    assert err <= 5e-2 * scale + 1e-3, (err, scale)

    print("KERNEL_OK")
</pallas_src>

<mosaic_0001>
module attributes {stable_mosaic.version = 11 : i64} {
  func.func @_ronn_fused_kernel(%arg0: i32, %arg1: i32, %arg2: memref<1x1x8x256xf32, #tpu.memory_space<vmem>>, %arg3: memref<3x8x24xbf16, #tpu.memory_space<vmem>>, %arg4: memref<3x8x1xf32, #tpu.memory_space<vmem>>, %arg5: memref<1x1x8x128xf32, #tpu.memory_space<vmem>>) attributes {dimension_semantics = [#tpu.dimension_semantics<parallel>, #tpu.dimension_semantics<parallel>], iteration_bounds = array<i64: 2, 1>, scalar_prefetch = 0 : i64, scratch_operands = 0 : i64, tpu.core_type = #tpu.core_type<tc>, window_params = [{transform_indices = @transform_0, window_bounds = array<i64: 1, 1, 8, 256>}, {pipeline_mode = #tpu.pipeline_mode<synchronous>, transform_indices = @transform_1, window_bounds = array<i64: 3, 8, 24>}, {pipeline_mode = #tpu.pipeline_mode<synchronous>, transform_indices = @transform_2, window_bounds = array<i64: 3, 8, 1>}, {transform_indices = @transform_3, window_bounds = array<i64: 1, 1, 8, 128>}]} {
    %c0 = arith.constant 0 : index
    %c0_0 = arith.constant 0 : index
    %c0_1 = arith.constant 0 : index
    %c0_2 = arith.constant 0 : index
    %0 = vector.load %arg2[%c0, %c0_0, %c0_1, %c0_2] : memref<1x1x8x256xf32, #tpu.memory_space<vmem>>, vector<1x1x8x256xf32>
    %1 = vector.shape_cast %0 : vector<1x1x8x256xf32> to vector<8x256xf32>
    %c255_i32 = arith.constant 255 : i32
    %2 = tpu.dynamic_rotate %1 by %c255_i32 dim 1 : vector<8x256xf32>, i32 -> vector<8x256xf32>
    %c254_i32 = arith.constant 254 : i32
    %3 = tpu.dynamic_rotate %1 by %c254_i32 dim 1 : vector<8x256xf32>, i32 -> vector<8x256xf32>
    %4 = tpu.concatenate %1, %2, %3 in 0 : vector<8x256xf32>, vector<8x256xf32>, vector<8x256xf32> -> vector<24x256xf32>
    %5 = arith.truncf %4 : vector<24x256xf32> to vector<24x256xbf16>
    %c0_3 = arith.constant 0 : index
    %c0_4 = arith.constant 0 : index
    %c0_5 = arith.constant 0 : index
    %6 = vector.load %arg3[%c0_3, %c0_4, %c0_5] : memref<3x8x24xbf16, #tpu.memory_space<vmem>>, vector<1x8x24xbf16>
    %7 = vector.shape_cast %6 : vector<1x8x24xbf16> to vector<8x24xbf16>
    %cst = arith.constant dense<0.000000e+00> : vector<8x256xf32>
    %8 = tpu.matmul %7, %5, %cst {dimension_numbers = #tpu.dot_dimension_numbers<[1], [0], [0], [1], [0, 0, 1, 1], [], []>} : vector<8x24xbf16>, vector<24x256xbf16>, vector<8x256xf32> -> vector<8x256xf32>
    %c0_6 = arith.constant 0 : index
    %c0_7 = arith.constant 0 : index
    %c0_8 = arith.constant 0 : index
    %9 = vector.load %arg4[%c0_6, %c0_7, %c0_8] : memref<3x8x1xf32, #tpu.memory_space<vmem>>, vector<1x8x1xf32>
    %10 = vector.shape_cast %9 : vector<1x8x1xf32> to vector<8x1xf32>
    %11 = vector.broadcast %10 : vector<8x1xf32> to vector<8x256xf32>
    %12 = arith.addf %8, %11 : vector<8x256xf32>
    %cst_9 = arith.constant 0.000000e+00 : f32
    %13 = vector.broadcast %cst_9 : f32 to vector<8x256xf32>
    %14 = arith.maximumf %12, %13 : vector<8x256xf32>
    %15 = arith.addf %14, %2 : vector<8x256xf32>
    %c254_i32_10 = arith.constant 254 : i32
    %16 = tpu.dynamic_rotate %15 by %c254_i32_10 dim 1 : vector<8x256xf32>, i32 -> vector<8x256xf32>
    %c252_i32 = arith.constant 252 : i32
    %17 = tpu.dynamic_rotate %15 by %c252_i32 dim 1 : vector<8x256xf32>, i32 -> vector<8x256xf32>
    %18 = tpu.concatenate %15, %16, %17 in 0 : vector<8x256xf32>, vector<8x256xf32>, vector<8x256xf32> -> vector<24x256xf32>
    %19 = arith.truncf %18 : vector<24x256xf32> to vector<24x256xbf16>
    %c1 = arith.constant 1 : index
    %c0_11 = arith.constant 0 : index
    %c0_12 = arith.constant 0 : index
    %20 = vector.load %arg3[%c1, %c0_11, %c0_12] : memref<3x8x24xbf16, #tpu.memory_space<vmem>>, vector<1x8x24xbf16>
    %21 = vector.shape_cast %20 : vector<1x8x24xbf16> to vector<8x24xbf16>
    %cst_13 = arith.constant dense<0.000000e+00> : vector<8x256xf32>
    %22 = tpu.matmul %21, %19, %cst_13 {dimension_numbers = #tpu.dot_dimension_numbers<[1], [0], [0], [1], [0, 0, 1, 1], [], []>} : vector<8x24xbf16>, vector<24x256xbf16>, vector<8x256xf32> -> vector<8x256xf32>
    %c1_14 = arith.constant 1 : index
    %c0_15 = arith.constant 0 : index
    %c0_16 = arith.constant 0 : index
    %23 = vector.load %arg4[%c1_14, %c0_15, %c0_16] : memref<3x8x1xf32, #tpu.memory_space<vmem>>, vector<1x8x1xf32>
    %24 = vector.shape_cast %23 : vector<1x8x1xf32> to vector<8x1xf32>
    %25 = vector.broadcast %24 : vector<8x1xf32> to vector<8x256xf32>
    %26 = arith.addf %22, %25 : vector<8x256xf32>
    %cst_17 = arith.constant 0.000000e+00 : f32
    %27 = vector.broadcast %cst_17 : f32 to vector<8x256xf32>
    %28 = arith.maximumf %26, %27 : vector<8x256xf32>
    %29 = arith.addf %28, %16 : vector<8x256xf32>
    %c252_i32_18 = arith.constant 252 : i32
    %30 = tpu.dynamic_rotate %29 by %c252_i32_18 dim 1 : vector<8x256xf32>, i32 -> vector<8x256xf32>
    %c248_i32 = arith.constant 248 : i32
    %31 = tpu.dynamic_rotate %29 by %c248_i32 dim 1 : vector<8x256xf32>, i32 -> vector<8x256xf32>
    %32 = tpu.concatenate %29, %30, %31 in 0 : vector<8x256xf32>, vector<8x256xf32>, vector<8x256xf32> -> vector<24x256xf32>
    %33 = arith.truncf %32 : vector<24x256xf32> to vector<24x256xbf16>
    %c2 = arith.constant 2 : index
    %c0_19 = arith.constant 0 : index
    %c0_20 = arith.constant 0 : index
    %34 = vector.load %arg3[%c2, %c0_19, %c0_20] : memref<3x8x24xbf16, #tpu.memory_space<vmem>>, vector<1x8x24xbf16>
    %35 = vector.shape_cast %34 : vector<1x8x24xbf16> to vector<8x24xbf16>
    %cst_21 = arith.constant dense<0.000000e+00> : vector<8x256xf32>
    %36 = tpu.matmul %35, %33, %cst_21 {dimension_numbers = #tpu.dot_dimension_numbers<[1], [0], [0], [1], [0, 0, 1, 1], [], []>} : vector<8x24xbf16>, vector<24x256xbf16>, vector<8x256xf32> -> vector<8x256xf32>
    %c2_22 = arith.constant 2 : index
    %c0_23 = arith.constant 0 : index
    %c0_24 = arith.constant 0 : index
    %37 = vector.load %arg4[%c2_22, %c0_23, %c0_24] : memref<3x8x1xf32, #tpu.memory_space<vmem>>, vector<1x8x1xf32>
    %38 = vector.shape_cast %37 : vector<1x8x1xf32> to vector<8x1xf32>
    %39 = vector.broadcast %38 : vector<8x1xf32> to vector<8x256xf32>
    %40 = arith.addf %36, %39 : vector<8x256xf32>
    %cst_25 = arith.constant 0.000000e+00 : f32
    %41 = vector.broadcast %cst_25 : f32 to vector<8x256xf32>
    %42 = arith.maximumf %40, %41 : vector<8x256xf32>
    %43 = arith.addf %42, %30 : vector<8x256xf32>
    %44 = vector.extract_strided_slice %43 {offsets = [0, 0], sizes = [8, 128], strides = [1, 1]} : vector<8x256xf32> to vector<8x128xf32>
    %c0_26 = arith.constant 0 : index
    %c0_27 = arith.constant 0 : index
    %c0_28 = arith.constant 0 : index
    %c0_29 = arith.constant 0 : index
    %45 = vector.load %arg5[%c0_26, %c0_27, %c0_28, %c0_29] : memref<1x1x8x128xf32, #tpu.memory_space<vmem>>, vector<1x1x8x128xf32>
    %46 = vector.shape_cast %45 : vector<1x1x8x128xf32> to vector<8x128xf32>
    %47 = vector.shape_cast %44 : vector<8x128xf32> to vector<1x1x8x128xf32>
    tpu.vector_store %arg5[%c0_26, %c0_27, %c0_28, %c0_29], %47 {strides = array<i32>} : memref<1x1x8x128xf32, #tpu.memory_space<vmem>>, vector<1x1x8x128xf32>,
    return
  }
  func.func @transform_0(%arg0: i32, %arg1: i32) -> (i32, i32, i32, i32) {
    %c0_i32 = arith.constant 0 : i32
    %c0_i32_0 = arith.constant 0 : i32
    %c0_i32_1 = arith.constant 0 : i32
    return %arg0, %arg1, %c0_i32, %c0_i32_0 : i32, i32, i32, i32
  }
  func.func @transform_1(%arg0: i32, %arg1: i32) -> (i32, i32, i32) {
    %c0_i32 = arith.constant 0 : i32
    %c0_i32_0 = arith.constant 0 : i32
    %c0_i32_1 = arith.constant 0 : i32
    %c0_i32_2 = arith.constant 0 : i32
    return %c0_i32, %c0_i32_0, %c0_i32_1 : i32, i32, i32
  }
  func.func @transform_2(%arg0: i32, %arg1: i32) -> (i32, i32, i32) {
    %c0_i32 = arith.constant 0 : i32
    %c0_i32_0 = arith.constant 0 : i32
    %c0_i32_1 = arith.constant 0 : i32
    %c0_i32_2 = arith.constant 0 : i32
    return %c0_i32, %c0_i32_0, %c0_i32_1 : i32, i32, i32
  }
  func.func @transform_3(%arg0: i32, %arg1: i32) -> (i32, i32, i32, i32) {
    %c0_i32 = arith.constant 0 : i32
    %c0_i32_0 = arith.constant 0 : i32
    %c0_i32_1 = arith.constant 0 : i32
    return %arg0, %arg1, %c0_i32, %c0_i32_0 : i32, i32, i32, i32
  }
}

</mosaic_0001>

<bundles_post_ra>
// kernel: tpu_custom_call.1
= control target key start
LH: loop header
LB: loop body
LE: loop exit
PB: predicated region body
PF: predicated region fallthrough
CT: control target
= control target key end

     0   :  { %8 = vsyncpa [#allocation3], 0  ;;  %s988_s0 = inlined_call_operand.hbm [shape: f32[2,1,8,256], index: 0, kind: input, shape index: {}]   ;;  %s989_s1 = inlined_call_operand.vmem [shape: bf16[3,8,24], index: 1, kind: input, shape index: {}]   ;;  %s990_s2 = inlined_call_operand.vmem [shape: f32[3,8,1], index: 2, kind: input, shape index: {}]   ;;  %s991_s3 = inlined_call_operand.hbm [shape: f32[2,1,8,128], index: 3, kind: output, shape index: {}]  }
   0x1   :  { %10 = vsyncpa [#allocation3 + $0x1], 0 }
   0x2   :  { %11 = vsyncpa [#allocation4], 0 }
   0x3   :  { %13 = vsyncpa [#allocation4 + $0x1], 0  ;;  %s792_s12 = smov 0   ;;  %s794_s13 = smov 0  }
   0x4   :  { %s796_s14 = smov 0   ;;  %s798_s15 = smov 0  }
   0x5   :  { %s800_s16 = smov 0   ;;  %s802_s17 = smov 0  }
   0x6 LB: > { %s546_s18 = sadd.s32 4294967295, %s763_s17   ;;  %s547_s19 = sadd.s32 4294967294, %s763_s17   ;;  %s763_s17 = sphi %s802_s17, %s19_s17   ;;  %s759_s16 = sphi %s800_s16, %s1003_s16   ;;  %s755_s15 = sphi %s798_s15, %s1002_s15   ;;  %s751_s14 = sphi %s796_s14, %s1001_s14   ;;  %s747_s13 = sphi %s794_s13, %s1000_s13   ;;  %s743_s12 = sphi %s792_s12, %s999_s12  }
   0x7   : > { %s31_s20 = sadd.s32 1, %s759_s16  ;;  %s40_s21 = sadd.s32 1, %s751_s14 }
   0x8   : > { %p33_p0 = scmp.ge.s32.totalorder %s31_s20, 2  ;;  %p47_p1 = scmp.ne.s32.totalorder %s751_s14, %s747_s13 }
   0x9   : > { %p48_p2 = scmp.eq.s32.totalorder %s763_s17, 0  ;;  %p53_p3 = scmp.ne.s32.totalorder %s747_s13, %s743_s12 }
   0xa   : > { %s1005_s20 = smov (%p33_p0, %s31_s20), 0  ;;  %p54_p5 = scmp.eq.s32.totalorder %s546_s18, 0 }
   0xb   : > { %p833_p4 = por %p48_p2, %p47_p1  ;;  %s35_s23 = ssub.s32 %s759_s16, %s1005_s20 }
   0xc   : > { %p121_p6 = scmp.eq.s32.totalorder %s546_s18, 1  ;;  %p38_p7 = scmp.eq.s32.totalorder %s35_s23, 0 }
   0xd   : > { %p839_p8 = por %p54_p5, %p53_p3  ;;  %p127_p10 = scmp.eq.s32.totalorder %s547_s19, 1 }
   0xe   : > { %p843_p9 = por %p121_p6, %p47_p1  ;;  %p583_p13 = scmp.lt.s32.totalorder %s763_s17, 2 }
   0xf   : > { %s848_s26 = scalar_select %p38_p7, %s751_s14, %s40_s21  }
  0x10   : > { %p850_p11 = por %p127_p10, %p53_p3  ;;  %s153_s28 = sand.u32 1, %s751_s14  }
  0x11   : > { %s550_s29 = sshll.u32 %s153_s28, 4  ;;  %s570_s30 = sshll.u32 %s759_s16, 8 }
  0x12   : > { %s995_s27 = scalar_select %p850_p11, 1, 0 }
  0x13   : > { %s165_s6 = scalar_lea.hbm %s988_s0, %s570_s30  ;;  %s157_s7 = scalar_lea.vmem [#allocation2], %s550_s29 }
  0x14   : > { %s167_s8 = sshll.u32 %s157_s7, 4  ;;  %p863_p0 = pnand %p583_p13, %p833_p4  ;;  %s168_s8 = int_to_ptr.vmem [resolvable:$true] %s167_s8 }
  0x15   : > { %p553_p1 = scmp.ge.s32.totalorder %s763_s17, 1  ;;  %p172_p2 = scmp.lt.s32.totalorder %s763_s17, 3 }
  0x16   : > { %s154_s10 = scalar_lea.sflag [#allocation3], %s153_s28  ;;  %p657_p3 = pneg %p863_p0 }
  0x17   : > { %s668_s11 = scalar_lea.vmem %s168_s8, 256  ;;  %s765_s18 = smov [#allocation2]  }
  0x18   : > { %p669_p5 = scmp.ne.s32.totalorder %s168_s8, %s668_s11  ;;  %s673_s19 = sshll.u32 %s765_s18, 4  ;;  %s674_s19 = int_to_ptr.vmem [resolvable:$false] %s673_s19 }
  0x19   : > { %s675_s21 = scalar_lea.vmem %s674_s19, 512  ;;  %p676_p10 = scmp.lt.s32.totalorder %s168_s8, %s674_s19 }
  0x1a   : > { %p671_p6 = pnand %p669_p5, %p657_p3  ;;  %p677_p12 = scmp.lt.s32.totalorder %s675_s21, %s668_s11 }
  0x1c   : > { %p672_p7 = pneg %p671_p6  ;;  %p678_p4 = por %p677_p12, %p676_p10 }
  0x1e   : > { %p679_p13 = pnand %p678_p4, %p672_p7 }
  0x20   : > { %682 = shalt.err (!%p679_p13)
}
  0x21   : > { %578 = dma.hbm_to_vmem [thread:$0]  (!%p863_p0), %s165_s6, 256, %s168_s8, %s154_s10  }
  0x22   : > { %p173_p11 = pnand %p553_p1, %p172_p2 }
  0x23   : > { %s878_s22 = sand.u32 (!%p173_p11), 1, %s747_s13  }
  0x24   : > { %176 = sbr.rel (%p173_p11) target bundleno = 1047 (0x417), region = 32  ;;  %s554_s23 = sshll.u32 (!%p173_p11), %s878_s22, 4 }
  0x25   : > { %s179_s28 = scalar_lea.sflag (!%p173_p11), [#allocation3], %s878_s22  ;;  %s182_s29 = scalar_lea.vmem (!%p173_p11), [#allocation2], %s554_s23 }
  0x29   : > { %734 = dma.done.wait (%p839_p8), %s179_s28, 256  }
  0x2a   : > { %736 = vsyncadd (%p839_p8), %s179_s28, 4294967040  ;;  %v206_v0 = vld [vmem:[%s182_s29] sm:$0xff]  ;;  %v207_v1 = vld [vmem:[%s182_s29 + $0x8] sm:$0xff]  ;;  %s766_s30 = smov 127   ;;  %v767_v3 = vmov 0   ;;  %s768_s4 = smov 126   ;;  %v212_v5 = vlaneseq }
  0x2b   : > { %v638_v2 = vpack.i.bf16 %v207_v1, %v206_v0  ;;  %210 = vrot.lane.b32.xlu1 %v207_v1, %s766_s30  ;;  %278 = vmatprep.mubr.bf16.mxu0 %v767_v3  ;;  %v229_v4 = vld [vmem:[%s990_s2] sm:$0xff]  ;;  %vm239_vm2 = vcmask 1043456   ;;  %vm235_vm3 = vcmask 195584   ;;  %v559_v33 = vld [vmem:[%s990_s2 + $0x8] sm:$0xff]  ;;  %s769_s10 = smov 124   ;;  %v563_v61 = vld [vmem:[%s990_s2 + $0x10] sm:$0xff] }
  0x2c   : > { %643 = vset.pattern.permute.xlu1 %v767_v3  ;;  %358 = vmatprep.mubr.bf16.mxu1 %v767_v3  ;;  %v890_v6 = vand.u32 127, %v212_v5  ;;  %v228_v21 = vld [vmem:[%s989_s1] sm:$0xf]  ;;  %v558_v49 = vld [vmem:[%s989_s1 + $0x4] sm:$0xf]  ;;  %s770_s23 = smov 120  }
  0x2d   : > { %639 = vrot.lane.b32.xlu0 %v638_v2, %s768_s4  ;;  %s450_s9 = scalar_lea.sflag [#allocation4], %s878_s22 }
  0x2e   : > { %654 = vset.pattern.permute.xlu0 %v767_v3  ;;  %vm221_vm0 = vcmp.lt.s32.totalorder %v890_v6, 126  ;;  %vm214_vm1 = vcmp.lt.s32.totalorder %v890_v6, 127  ;;  %vm301_vm4 = vcmp.lt.s32.totalorder %v890_v6, 124  ;;  %vm381_vm5 = vcmp.lt.s32.totalorder %v890_v6, 120 }
  0x2f   : > { %232 = vperm.xlu1 %643, %v229_v4  }
  0x31   : > { %208 = vrot.lane.b32.xlu0 %v206_v0, %s766_s30  ;;  %s555_s30 = sshll.u32 %s878_s22, 3 }
  0x32   : > { %s204_s5 = scalar_lea.vmem [#allocation5], %s555_s30 }
  0x33   : > { %s464_s6 = sshll.u32 %s204_s5, 4  ;;  %s465_s6 = int_to_ptr.vmem [resolvable:$true] %s464_s6 }
  0x9d   : > { %v211_v10 = vpop.permute.xlu1 %210 }
  0x9f   : > { %v640_v7 = vpop.permute.xlu0 %639 }
  0xa0   : > { %v642_v8 = vunpack.i.h.bf16 %v640_v7  ;;  %v641_v9 = vunpack.i.l.bf16 %v640_v7 }
  0xa2   : > { %v223_v11 = vsel %vm221_vm0, %v642_v8, %v641_v9  ;;  %v222_v12 = vsel %vm221_vm0, %v641_v9, %v642_v8 }
  0xa3   : > { %v209_v13 = vpop.permute.xlu0 %208  ;;  %v227_v14 = vpack.c.bf16 %v223_v11, %v223_v11  ;;  %v226_v15 = vpack.c.bf16 %v222_v12, %v222_v12 }
  0xa4   : > { %v215_v16 = vsel %vm214_vm1, %v209_v13, %v211_v10  ;;  %v216_v17 = vsel %vm214_vm1, %v211_v10, %v209_v13 }
  0xa5   : > { %v225_v18 = vpack.c.bf16 %v216_v17, %v207_v1  ;;  %556 = vmatprep.subr.msk.bf16.mxu0 %vm239_vm2, %v227_v14  ;;  %v241_v19 = vsel %vm239_vm2, %v226_v15, 0  ;;  %v224_v20 = vpack.c.bf16 %v215_v16, %v206_v0  ;;  %v562_v14 = vld [vmem:[%s989_s1 + $0x8] sm:$0xf] }
  0xa6   : > { %259 = vmatpush1.bf16.msra.mxu0 %v241_v19 }
  0xa7   : > { %260 = vmatprep.subr.bf16.mxu0 %v225_v18 }
  0xaa   : > { %261 = vmatpush1.bf16.msra.mxu0 %v224_v20  ;;  %v233_v22 = vpop.permute.xlu1 %232 }
  0xad   : > { %557 = vmatmul.mubr.msk.bf16.vlgmr.msra.gmra.mxu0 %vm235_vm3, %v228_v21 }
  0xae   : > { %438 = vmatprep.mubr.bf16.mxu0 %v767_v3 }
 0x16d   : > { %v280_v23 = vpop.f32.mrf.mxu0 }
 0x16e   : > { %v281_v24 = vadd.f32 %v280_v23, %v233_v22 }
 0x16f   : > { %v282_v25 = vpop.f32.mrf.mxu0 }
 0x170   : > { %v287_v26 = vmax.f32 %v281_v24, 0.0  ;;  %v283_v27 = vadd.f32 %v282_v25, %v233_v22 }
 0x171   : > { %v284_v28 = vpop.f32.mrf.mxu0 }
 0x172   : > { %v289_v29 = vadd.f32 %v287_v26, %v215_v16  ;;  %v288_v30 = vmax.f32 %v283_v27, 0.0 }
 0x173   : > { %v285_v31 = vpop.f32.mrf.mxu0 }
 0x174   : > { %v290_v32 = vadd.f32 %v288_v30, %v216_v17  ;;  %291 = vrot.lane.b32.xlu1 %v289_v29, %s768_s4 }
 0x176   : > { %v644_v34 = vpack.i.bf16 %v290_v32, %v289_v29 }
 0x178   : > { %645 = vrot.lane.b32.xlu0 %v644_v34, %s769_s10  ;;  %314 = vperm.xlu1 %643, %v559_v33  }
 0x17c   : > { %293 = vrot.lane.b32.xlu0 %v290_v32, %s768_s4  ;;  %s567_s4 = sshll.u32 %s755_s15, 7  ;;  %s771_s15 = smov [#allocation5]  }
 0x17d   : > { %s946_s8 = scalar_lea.hbm %s991_s3, %s567_s4  ;;  %s687_s11 = sshll.u32 %s771_s15, 4  ;;  %s688_s11 = int_to_ptr.vmem [resolvable:$false] %s687_s11 }
 0x17e   : > { %s689_s18 = scalar_lea.vmem %s688_s11, 256  ;;  %p690_p0 = scmp.lt.s32.totalorder %s465_s6, %s688_s11 }
 0x1e6   : > { %v292_v40 = vpop.permute.xlu1 %291 }
 0x1ea   : > { %v646_v35 = vpop.permute.xlu0 %645 }
 0x1eb   : > { %v648_v36 = vunpack.i.h.bf16 %v646_v35  ;;  %v647_v37 = vunpack.i.l.bf16 %v646_v35 }
 0x1ed   : > { %v303_v38 = vsel %vm301_vm4, %v648_v36, %v647_v37  ;;  %v302_v39 = vsel %vm301_vm4, %v647_v37, %v648_v36 }
 0x1ee   : > { %v294_v41 = vpop.permute.xlu0 %293  ;;  %v307_v42 = vpack.c.bf16 %v303_v38, %v303_v38  ;;  %v306_v43 = vpack.c.bf16 %v302_v39, %v302_v39 }
 0x1ef   : > { %v296_v44 = vsel %vm221_vm0, %v294_v41, %v292_v40  ;;  %v295_v45 = vsel %vm221_vm0, %v292_v40, %v294_v41 }
 0x1f0   : > { %v305_v46 = vpack.c.bf16 %v296_v44, %v290_v32  ;;  %560 = vmatprep.subr.msk.bf16.mxu1 %vm239_vm2, %v307_v42  ;;  %v321_v47 = vsel %vm239_vm2, %v306_v43, 0  ;;  %v304_v48 = vpack.c.bf16 %v295_v45, %v289_v29 }
 0x1f1   : > { %339 = vmatpush1.bf16.msra.mxu1 %v321_v47 }
 0x1f2   : > { %340 = vmatprep.subr.bf16.mxu1 %v305_v46 }
 0x1f3   : > { %v315_v50 = vpop.permute.xlu1 %314 }
 0x1f5   : > { %341 = vmatpush1.bf16.msra.mxu1 %v304_v48 }
 0x1f8   : > { %561 = vmatmul.mubr.msk.bf16.vlgmr.msra.gmra.mxu1 %vm235_vm3, %v558_v49 }
 0x2b8   : > { %v360_v51 = vpop.f32.mrf.mxu1 }
 0x2b9   : > { %v361_v52 = vadd.f32 %v360_v51, %v315_v50 }
 0x2ba   : > { %v362_v53 = vpop.f32.mrf.mxu1 }
 0x2bb   : > { %v367_v54 = vmax.f32 %v361_v52, 0.0  ;;  %v363_v55 = vadd.f32 %v362_v53, %v315_v50 }
 0x2bc   : > { %v364_v56 = vpop.f32.mrf.mxu1 }
 0x2bd   : > { %v369_v57 = vadd.f32 %v367_v54, %v295_v45  ;;  %v368_v58 = vmax.f32 %v363_v55, 0.0 }
 0x2be   : > { %v365_v59 = vpop.f32.mrf.mxu1 }
 0x2bf   : > { %v370_v60 = vadd.f32 %v368_v58, %v296_v44  ;;  %371 = vrot.lane.b32.xlu1 %v369_v57, %s769_s10 }
 0x2c1   : > { %v649_v62 = vpack.i.bf16 %v370_v60, %v369_v57 }
 0x2c3   : > { %650 = vrot.lane.b32.xlu0 %v649_v62, %s770_s23  ;;  %394 = vperm.xlu1 %643, %v563_v61  }
 0x2c7   : > { %373 = vrot.lane.b32.xlu0 %v370_v60, %s769_s10  ;;  %s683_s10 = scalar_lea.vmem %s465_s6, 128 }
 0x2c8   : > { %p684_p8 = scmp.ne.s32.totalorder %s465_s6, %s683_s10  ;;  %p691_p1 = scmp.lt.s32.totalorder %s689_s18, %s683_s10 }
 0x2ca   : > { %p685_p11 = pnand %p684_p8, %p843_p9  ;;  %p692_p2 = por %p691_p1, %p690_p0 }
 0x2cc   : > { %p686_p12 = pneg %p685_p11 }
 0x2ce   : > { %p693_p3 = pnand %p692_p2, %p686_p12 }
 0x331   : > { %v372_v4 = vpop.permute.xlu1 %371 }
 0x335   : > { %v651_v63 = vpop.permute.xlu0 %650 }
 0x336   : > { %v653_v0 = vunpack.i.h.bf16 %v651_v63  ;;  %v652_v1 = vunpack.i.l.bf16 %v651_v63 }
 0x338   : > { %v383_v2 = vsel %vm381_vm5, %v653_v0, %v652_v1  ;;  %v382_v3 = vsel %vm381_vm5, %v652_v1, %v653_v0 }
 0x339   : > { %v387_v5 = vpack.c.bf16 %v383_v2, %v383_v2  ;;  %v374_v7 = vpop.permute.xlu0 %373  ;;  %v386_v8 = vpack.c.bf16 %v382_v3, %v382_v3 }
 0x33a   : > { %v376_v9 = vsel %vm301_vm4, %v374_v7, %v372_v4  ;;  %v375_v10 = vsel %vm301_vm4, %v372_v4, %v374_v7 }
 0x33b   : > { %v385_v11 = vpack.c.bf16 %v376_v9, %v370_v60  ;;  %564 = vmatprep.subr.msk.bf16.mxu0 %vm239_vm2, %v387_v5  ;;  %v401_v12 = vsel %vm239_vm2, %v386_v8, 0  ;;  %v384_v13 = vpack.c.bf16 %v375_v10, %v369_v57 }
 0x33c   : > { %419 = vmatpush1.bf16.msra.mxu0 %v401_v12 }
 0x33d   : > { %420 = vmatprep.subr.bf16.mxu0 %v385_v11 }
 0x33e   : > { %v395_v6 = vpop.permute.xlu1 %394 }
 0x340   : > { %421 = vmatpush1.bf16.msra.mxu0 %v384_v13 }
 0x343   : > { %565 = vmatmul.mubr.msk.bf16.vlgmr.msra.gmra.mxu0 %vm235_vm3, %v562_v14 }
 0x403   : > { %v440_v15 = vpop.f32.mrf.mxu0 }
 0x404   : > { %v441_v16 = vadd.f32 %v440_v15, %v395_v6 }
 0x405   : > { %v442_v17 = vpop.f32.mrf.mxu0 }
 0x406   : > { %v446_v18 = vmax.f32 %v441_v16, 0.0 }
 0x407   : > { %v443_v19 = vpop.f32.mrf.mxu0 }
 0x408   : > { %v447_v20 = vadd.f32 %v446_v18, %v375_v10 }
 0x409   : > { %v444_v21 = vpop.f32.mrf.mxu0 }
 0x40a   : > { %448 = vst [vmem:[%s204_s5] sm:$0xff] %v447_v20 }
 0x40b   : > { %696 = shalt.err (!%p693_p3)
}
 0x40c   : > { %s697_s19 = scalar_lea.hbm %s946_s8, 128  ;;  %s701_s23 = scalar_lea.hbm %s991_s3, 256 }
 0x40d   : > { %p698_p5 = scmp.ne.s32.totalorder %s946_s8, %s697_s19  ;;  %p702_p10 = scmp.lt.s32.totalorder %s946_s8, %s991_s3 }
 0x40e   : > { %p703_p4 = scmp.lt.s32.totalorder %s701_s23, %s697_s19 }
 0x40f   : > { %p699_p6 = pnand %p698_p5, %p843_p9 }
 0x410   : > { %p704_p13 = por %p703_p4, %p702_p10 }
 0x411   : > { %p700_p7 = pneg %p699_p6 }
 0x413   : > { %p705_p8 = pnand %p704_p13, %p700_p7 }
 0x415   : > { %708 = shalt.err (!%p705_p8)
}
 0x416   : > { %573 = dma.vmem_to_hbm [thread:$0]  (%p843_p9), %s465_s6, 128, %s946_s8, %s450_s9  }
 0x417 PF: > { %s476_s30 = sand.u32 1, %s743_s12   ;;  %p997_p11 = scmp.ne.s32.totalorder %s995_s27, 0 }
 0x418   : > { %p998_p12 = scmp.ge.s32.totalorder %s763_s17, 2  ;;  %s477_s4 = scalar_lea.sflag [#allocation4], %s476_s30 }
 0x41a   : > { %p580_p0 = pnand %p998_p12, %p997_p11 }
 0x41c   : > { %p581_p1 = pneg %p580_p0 }
 0x41e   : > { %738 = dma.done.wait (%p581_p1), %s477_s4, 128  }
 0x41f   : > { %740 = vsyncadd (%p581_p1), %s477_s4, 4294967168  ;;  %s19_s17 = sadd.s32 1, %s763_s17   ;;  %s999_s12 = smov %s747_s13 }
 0x420   : > { %p16_p2 = scmp.ge.s32.totalorder %s19_s17, 4   ;;  %s1000_s13 = smov %s751_s14 }
 0x421   : > { %s1001_s14 = smov %s848_s26  ;;  %s1002_s15 = smov %s759_s16 }
 0x422   : > { %s1003_s16 = smov %s1005_s20  ;;  %18 = sbr.rel (!%p16_p2) target bundleno = 6 (0x6), region = 81 }
 0x427   :  { %482 = vsyncpa [#allocation3], 1 }
 0x428   :  { %484 = vsyncpa [#allocation3 + $0x1], 1 }
 0x429   :  { %485 = vsyncpa [#allocation4], 1 }
 0x42a   :  { %487 = vsyncpa [#allocation4 + $0x1], 1 }

</bundles_post_ra>
